<compile_context>
chip_gen: v6e
topology: v6e:2x2x1
jax: 0.10.0
libtpu: 0.0.40
codegen_flags: <defaults>
</compile_context>

<pallas_src>
import functools

import jax
import jax.numpy as jnp
from jax.experimental import pallas as pl
from jax.experimental.pallas import tpu as pltpu

LANES = 128
ACC_ROWS = 256   # fixed accumulator height: 32 f32 vregs per accumulator
NCORES = 2       # leading core-parallel grid axis (v7x megacore); harmless on 1-TC chips


def _masked_l1_kernel(pred_ref, gt_ref, sum_out, cnt_out, sum_acc, cnt_acc, *,
                      tile_rows, acc_rows, total_rows, tiles_per_core,
                      first_masked_tile, total_grid_tiles):
    c = pl.program_id(0)                 # core index (parallel axis)
    t = pl.program_id(1)                 # tile index within this core
    g = c * tiles_per_core + t           # global (unclamped) tile index

    @pl.when(t == 0)
    def _():
        sum_acc[...] = jnp.zeros_like(sum_acc)
        cnt_acc[...] = jnp.zeros_like(cnt_acc)

    folds = tile_rows // acc_rows

    def accumulate(mask_rows):
        # Fold the (tile_rows, 128) tile into the fixed (acc_rows, 128) accumulators with
        # pure elementwise VPU work; static ref slices are zero-cost views.
        for f in range(folds):
            sl = pl.ds(f * acc_rows, acc_rows)
            p = pred_ref[sl, :].astype(jnp.float32)
            gtv = gt_ref[sl, :].astype(jnp.float32)
            valid = gtv > 0.0
            if mask_rows:
                # Row ids are relative to the *unclamped* tile index so both ragged-tail
                # rows and whole phantom tiles (duplicated DMA, clamped index_map) are
                # excluded entirely.
                row_ids = (jax.lax.broadcasted_iota(jnp.int32, (acc_rows, LANES), 0)
                           + g * tile_rows + f * acc_rows)
                valid = jnp.logical_and(valid, row_ids < total_rows)
            diff = jnp.abs(p - gtv)
            # NOTE: must stay a select (jnp.where), not `diff * valid`, so NaN/Inf garbage
            # read from out-of-bounds rows of a ragged last tile can never propagate.
            sum_acc[...] += jnp.where(valid, diff, 0.0)
            cnt_acc[...] += valid.astype(jnp.float32)

    if first_masked_tile >= total_grid_tiles:
        # Static: row count divides evenly and there are no phantom tiles -> no masking ever.
        accumulate(mask_rows=False)
    else:
        # Only the ragged-tail / phantom tiles pay for the iota row mask.
        @pl.when(g < first_masked_tile)
        def _():
            accumulate(mask_rows=False)

        @pl.when(g >= first_masked_tile)
        def _():
            accumulate(mask_rows=True)

    # Per-core finalize: one sublane (XLU) reduce, lane-dense (1, 128) store per output.
    @pl.when(t == pl.num_programs(1) - 1)
    def _():
        sum_out[...] = jnp.sum(sum_acc[...], axis=0, keepdims=True)
        cnt_out[...] = jnp.sum(cnt_acc[...], axis=0, keepdims=True)


@functools.partial(jax.jit, static_argnames=("loss_weight",))
def supervised_depth_loss(inv_depth, gt_inv_depth, loss_weight=1.0):
    """Masked L1 supervised depth loss (SupervisedDepthLoss with loss_type='L1')."""
    pred = inv_depth.reshape(-1)
    gt = gt_inv_depth.reshape(-1)
    n = pred.shape[0]

    # Only pad to the 128-lane boundary when strictly necessary (< 128 elements).
    # Padded gt == 0 -> excluded by the mask.
    rem = n % LANES
    if rem:
        pad = LANES - rem
        pred = jnp.pad(pred, (0, pad))
        gt = jnp.pad(gt, (0, pad))

    rows = pred.shape[0] // LANES
    pred2d = pred.reshape(rows, LANES)
    gt2d = gt.reshape(rows, LANES)

    # ~1 MiB per input block per pipeline buffer regardless of dtype.
    itemsize = pred.dtype.itemsize
    max_tile = 4096 if itemsize <= 2 else 2048
    tile_rows = rows if rows <= max_tile else max_tile
    # Fixed accumulator unless the (single) tile is small / not 256-divisible.
    if tile_rows > ACC_ROWS and tile_rows % ACC_ROWS == 0:
        acc_rows = ACC_ROWS
    else:
        acc_rows = tile_rows

    num_tiles = pl.cdiv(rows, tile_rows)
    ncores = NCORES if num_tiles >= NCORES else 1
    tiles_per_core = pl.cdiv(num_tiles, ncores)
    total_grid_tiles = ncores * tiles_per_core
    # First global tile index whose row range extends past `rows` (ragged tail or phantom).
    first_masked_tile = rows // tile_rows if rows % tile_rows else num_tiles

    def in_map(c, t):
        # Clamp phantom tiles (last core, odd tile count) onto a valid tile; their
        # contribution is zeroed in-kernel via the row mask.
        return (jnp.minimum(c * tiles_per_core + t, num_tiles - 1), 0)

    kernel = functools.partial(
        _masked_l1_kernel,
        tile_rows=tile_rows, acc_rows=acc_rows, total_rows=rows,
        tiles_per_core=tiles_per_core, first_masked_tile=first_masked_tile,
        total_grid_tiles=total_grid_tiles)

    sums, cnts = pl.pallas_call(
        kernel,
        out_shape=(
            jax.ShapeDtypeStruct((ncores, LANES), jnp.float32),  # per-core |diff| partial sums
            jax.ShapeDtypeStruct((ncores, LANES), jnp.float32),  # per-core valid-pixel counts
        ),
        grid_spec=pltpu.PrefetchScalarGridSpec(
            num_scalar_prefetch=0,
            grid=(ncores, tiles_per_core),
            in_specs=[
                pl.BlockSpec((tile_rows, LANES), in_map),
                pl.BlockSpec((tile_rows, LANES), in_map),
            ],
            out_specs=[
                pl.BlockSpec((1, LANES), lambda c, t: (c, 0)),
                pl.BlockSpec((1, LANES), lambda c, t: (c, 0)),
            ],
            scratch_shapes=[
                pltpu.VMEM((acc_rows, LANES), jnp.float32),  # running masked |diff| sums
                pltpu.VMEM((acc_rows, LANES), jnp.float32),  # running mask counts
            ],
        ),
        compiler_params=pltpu.CompilerParams(
            dimension_semantics=("parallel", "arbitrary"),
        ),
    )(pred2d, gt2d)

    # Matches torch boolean-index + L1Loss (NaN if no valid pixel, same as PyTorch).
    return loss_weight * (jnp.sum(sums) / jnp.sum(cnts))


def _reference_loss(inv_depth, gt_inv_depth, loss_weight=1.0):
    pred = inv_depth.astype(jnp.float32)
    gt = gt_inv_depth.astype(jnp.float32)
    mask = gt > 0.0
    diff = jnp.abs(pred - gt)
    return loss_weight * (
        jnp.sum(jnp.where(mask, diff, 0.0)) / jnp.sum(mask.astype(jnp.float32))
    )


def _make_inputs(key, shape, dtype=jnp.float32):
    k1, k2, k3 = jax.random.split(key, 3)
    inv_depth = jax.nn.softplus(jax.random.normal(k1, shape, jnp.float32)).astype(dtype)
    gt = jax.nn.softplus(jax.random.normal(k2, shape, jnp.float32))
    invalid = jax.random.uniform(k3, shape) < 0.3  # simulate missing gt pixels
    gt = jnp.where(invalid, 0.0, gt).astype(dtype)
    return inv_depth, gt


def _check(key, shape, dtype=jnp.float32, rtol=1e-5, atol=1e-6):
    inv_d, gt_d = _make_inputs(key, shape, dtype)
    loss = supervised_depth_loss(inv_d, gt_d, loss_weight=1.0)
    jax.block_until_ready(loss)
    ref = _reference_loss(inv_d, gt_d, loss_weight=1.0)
    assert jnp.allclose(loss, ref, rtol=rtol, atol=atol), (shape, dtype, loss, ref)


if __name__ == "__main__":
    key = jax.random.PRNGKey(0)
    k_a, k_b, k_c, k_d, k_e = jax.random.split(key, 5)

    # 1) Small module-shaped input [B,1,H,W]: single tile, lane-aligned.
    _check(k_a, (2, 1, 16, 16))

    # 2) Non-lane-aligned element count (510 elems -> tiny 2-element pad path).
    _check(k_b, (2, 1, 15, 17))

    # 3) Multi-tile + ragged tail + 2-way core split (2176 rows -> 2048-row tiles, tail masked).
    _check(k_c, (1, 1, 544, 512))

    # 4) Odd tile count -> phantom tile on core 1 (6144 rows -> 3 real tiles + 1 masked phantom).
    _check(k_d, (3, 1, 512, 512))

    # 5) bf16 streaming path (native-dtype DMA, f32 accumulation).
    _check(k_e, (2, 1, 64, 64), dtype=jnp.bfloat16)

    print("KERNEL_OK")
</pallas_src>

<mosaic_0001>
module attributes {stable_mosaic.version = 11 : i64} {
  func.func @_masked_l1_kernel(%arg0: i32, %arg1: i32, %arg2: memref<4x128xf32, #tpu.memory_space<vmem>>, %arg3: memref<4x128xf32, #tpu.memory_space<vmem>>, %arg4: memref<1x128xf32, #tpu.memory_space<vmem>>, %arg5: memref<1x128xf32, #tpu.memory_space<vmem>>, %arg6: memref<4x128xf32, #tpu.memory_space<vmem>>, %arg7: memref<4x128xf32, #tpu.memory_space<vmem>>) attributes {dimension_semantics = [#tpu.dimension_semantics<parallel>, #tpu.dimension_semantics<arbitrary>], iteration_bounds = array<i64: 1, 1>, scalar_prefetch = 0 : i64, scratch_operands = 2 : i64, tpu.core_type = #tpu.core_type<tc>, window_params = [{transform_indices = @transform_0, window_bounds = array<i64: 4, 128>}, {transform_indices = @transform_1, window_bounds = array<i64: 4, 128>}, {transform_indices = @transform_2, window_bounds = array<i64: 1, 128>}, {transform_indices = @transform_3, window_bounds = array<i64: 1, 128>}]} {
    %c0_i32 = arith.constant 0 : i32
    %0 = arith.cmpi eq, %arg1, %c0_i32 : i32
    %1 = arith.extui %0 : i1 to i32
    %c0_i32_0 = arith.constant 0 : i32
    %2 = arith.cmpi ne, %1, %c0_i32_0 : i32
    scf.if %2 {
      %cst_15 = arith.constant 0.000000e+00 : f32
      %22 = vector.broadcast %cst_15 : f32 to vector<4x128xf32>
      %c0_16 = arith.constant 0 : index
      %c0_17 = arith.constant 0 : index
      %23 = vector.load %arg6[%c0_16, %c0_17] : memref<4x128xf32, #tpu.memory_space<vmem>>, vector<4x128xf32>
      tpu.vector_store %arg6[%c0_16, %c0_17], %22 {strides = array<i32>} : memref<4x128xf32, #tpu.memory_space<vmem>>, vector<4x128xf32>,
      %cst_18 = arith.constant 0.000000e+00 : f32
      %24 = vector.broadcast %cst_18 : f32 to vector<4x128xf32>
      %c0_19 = arith.constant 0 : index
      %c0_20 = arith.constant 0 : index
      %25 = vector.load %arg7[%c0_19, %c0_20] : memref<4x128xf32, #tpu.memory_space<vmem>>, vector<4x128xf32>
      tpu.vector_store %arg7[%c0_19, %c0_20], %24 {strides = array<i32>} : memref<4x128xf32, #tpu.memory_space<vmem>>, vector<4x128xf32>,
    } else {
    }
    %c0 = arith.constant 0 : index
    %c0_1 = arith.constant 0 : index
    %3 = vector.load %arg2[%c0, %c0_1] : memref<4x128xf32, #tpu.memory_space<vmem>>, vector<4x128xf32>
    %c0_2 = arith.constant 0 : index
    %c0_3 = arith.constant 0 : index
    %4 = vector.load %arg3[%c0_2, %c0_3] : memref<4x128xf32, #tpu.memory_space<vmem>>, vector<4x128xf32>
    %cst = arith.constant 0.000000e+00 : f32
    %5 = vector.broadcast %cst : f32 to vector<4x128xf32>
    %6 = arith.cmpf ogt, %4, %5 : vector<4x128xf32>
    %7 = arith.subf %3, %4 : vector<4x128xf32>
    %8 = math.absf %7 : vector<4x128xf32>
    %c0_4 = arith.constant 0 : index
    %c0_5 = arith.constant 0 : index
    %9 = vector.load %arg6[%c0_4, %c0_5] : memref<4x128xf32, #tpu.memory_space<vmem>>, vector<4x128xf32>
    %cst_6 = arith.constant 0.000000e+00 : f32
    %10 = vector.broadcast %cst_6 : f32 to vector<4x128xf32>
    %11 = arith.select %6, %8, %10 : vector<4x128xi1>, vector<4x128xf32>
    %12 = arith.addf %9, %11 : vector<4x128xf32>
    %c0_7 = arith.constant 0 : index
    %c0_8 = arith.constant 0 : index
    %13 = vector.load %arg6[%c0_7, %c0_8] : memref<4x128xf32, #tpu.memory_space<vmem>>, vector<4x128xf32>
    tpu.vector_store %arg6[%c0_7, %c0_8], %12 {strides = array<i32>} : memref<4x128xf32, #tpu.memory_space<vmem>>, vector<4x128xf32>,
    %c0_9 = arith.constant 0 : index
    %c0_10 = arith.constant 0 : index
    %14 = vector.load %arg7[%c0_9, %c0_10] : memref<4x128xf32, #tpu.memory_space<vmem>>, vector<4x128xf32>
    %15 = arith.extui %6 : vector<4x128xi1> to vector<4x128xi32>
    %16 = arith.sitofp %15 : vector<4x128xi32> to vector<4x128xf32>
    %17 = arith.addf %14, %16 : vector<4x128xf32>
    %c0_11 = arith.constant 0 : index
    %c0_12 = arith.constant 0 : index
    %18 = vector.load %arg7[%c0_11, %c0_12] : memref<4x128xf32, #tpu.memory_space<vmem>>, vector<4x128xf32>
    tpu.vector_store %arg7[%c0_11, %c0_12], %17 {strides = array<i32>} : memref<4x128xf32, #tpu.memory_space<vmem>>, vector<4x128xf32>,
    %c0_i32_13 = arith.constant 0 : i32
    %19 = arith.cmpi eq, %arg1, %c0_i32_13 : i32
    %20 = arith.extui %19 : i1 to i32
    %c0_i32_14 = arith.constant 0 : i32
    %21 = arith.cmpi ne, %20, %c0_i32_14 : i32
    scf.if %21 {
      %c0_15 = arith.constant 0 : index
      %c0_16 = arith.constant 0 : index
      %22 = vector.load %arg6[%c0_15, %c0_16] : memref<4x128xf32, #tpu.memory_space<vmem>>, vector<4x128xf32>
      %cst_17 = arith.constant dense<0.000000e+00> : vector<128xf32>
      %23 = vector.multi_reduction <add>, %22, %cst_17 [0] : vector<4x128xf32> to vector<128xf32>
      %24 = vector.shape_cast %23 : vector<128xf32> to vector<1x128xf32>
      %c0_18 = arith.constant 0 : index
      %c0_19 = arith.constant 0 : index
      %25 = vector.load %arg4[%c0_18, %c0_19] : memref<1x128xf32, #tpu.memory_space<vmem>>, vector<1x128xf32>
      tpu.vector_store %arg4[%c0_18, %c0_19], %24 {strides = array<i32>} : memref<1x128xf32, #tpu.memory_space<vmem>>, vector<1x128xf32>,
      %c0_20 = arith.constant 0 : index
      %c0_21 = arith.constant 0 : index
      %26 = vector.load %arg7[%c0_20, %c0_21] : memref<4x128xf32, #tpu.memory_space<vmem>>, vector<4x128xf32>
      %cst_22 = arith.constant dense<0.000000e+00> : vector<128xf32>
      %27 = vector.multi_reduction <add>, %26, %cst_22 [0] : vector<4x128xf32> to vector<128xf32>
      %28 = vector.shape_cast %27 : vector<128xf32> to vector<1x128xf32>
      %c0_23 = arith.constant 0 : index
      %c0_24 = arith.constant 0 : index
      %29 = vector.load %arg5[%c0_23, %c0_24] : memref<1x128xf32, #tpu.memory_space<vmem>>, vector<1x128xf32>
      tpu.vector_store %arg5[%c0_23, %c0_24], %28 {strides = array<i32>} : memref<1x128xf32, #tpu.memory_space<vmem>>, vector<1x128xf32>,
    } else {
    }
    return
  }
  func.func @transform_0(%arg0: i32, %arg1: i32) -> (i32, i32) {
    %c1_i32 = arith.constant 1 : i32
    %0 = arith.muli %arg0, %c1_i32 : i32
    %1 = arith.addi %0, %arg1 : i32
    %c0_i32 = arith.constant 0 : i32
    %2 = arith.minsi %1, %c0_i32 : i32
    %c0_i32_0 = arith.constant 0 : i32
    %c0_i32_1 = arith.constant 0 : i32
    return %2, %c0_i32_0 : i32, i32
  }
  func.func @transform_1(%arg0: i32, %arg1: i32) -> (i32, i32) {
    %c1_i32 = arith.constant 1 : i32
    %0 = arith.muli %arg0, %c1_i32 : i32
    %1 = arith.addi %0, %arg1 : i32
    %c0_i32 = arith.constant 0 : i32
    %2 = arith.minsi %1, %c0_i32 : i32
    %c0_i32_0 = arith.constant 0 : i32
    %c0_i32_1 = arith.constant 0 : i32
    return %2, %c0_i32_0 : i32, i32
  }
  func.func @transform_2(%arg0: i32, %arg1: i32) -> (i32, i32) {
    %c0_i32 = arith.constant 0 : i32
    %c0_i32_0 = arith.constant 0 : i32
    return %arg0, %c0_i32 : i32, i32
  }
  func.func @transform_3(%arg0: i32, %arg1: i32) -> (i32, i32) {
    %c0_i32 = arith.constant 0 : i32
    %c0_i32_0 = arith.constant 0 : i32
    return %arg0, %c0_i32 : i32, i32
  }
}

</mosaic_0001>

<bundles_post_ra>
// kernel: supervised_depth_loss.1
= control target key start
LH: loop header
LB: loop body
LE: loop exit
PB: predicated region body
PF: predicated region fallthrough
CT: control target
= control target key end

     0   :  { %v131_v0 = vmov 0.0   ;;  %vm91_vm1 = vcmask 1043456   ;;  %s164_s0 = inlined_call_operand.vmem [shape: f32[4,128], index: 0, kind: input, shape index: {}]   ;;  %s165_s1 = inlined_call_operand.vmem [shape: f32[4,128], index: 1, kind: input, shape index: {}]   ;;  %s166_s2 = inlined_call_operand.vmem [shape: f32[1,128], index: 2, kind: output, shape index: {0}]   ;;  %s167_s3 = inlined_call_operand.vmem [shape: f32[1,128], index: 3, kind: output, shape index: {1}]  }
   0x1   :  { %71 = vst [vmem:[#allocation2] sm:$0xf] %v131_v0  ;;  %72 = vst [vmem:[#allocation3] sm:$0xf] %v131_v0  ;;  %v73_v1 = vld [vmem:[%s164_s0] sm:$0xf] }
   0x2   :  { %v74_v2 = vld [vmem:[%s165_s1] sm:$0xf] }
   0x3   :  { %v76_v3 = vsub.f32 %v73_v1, %v74_v2  ;;  %vm75_vm0 = vcmp.gt.f32.partialorder %v74_v2, 0.0 }
   0x4   :  { %v129_v6 = vsel %vm75_vm0, 1.0, %v131_v0 }
   0x5   :  { %v77_v4 = vand.u32 2147483647, %v76_v3 }
   0x7   :  { %v79_v5 = vsel %vm75_vm0, %v77_v4, 0.0 }
   0x8   :  { %v78_v7 = vld [vmem:[#allocation2] sm:$0xf]  ;;  %v82_v8 = vld [vmem:[#allocation3] sm:$0xf] }
   0x9   :  { %v80_v9 = vadd.f32 %v79_v5, %v78_v7  ;;  %v85_v10 = vadd.f32 %v129_v6, %v82_v8 }
   0xb   :  { %81 = vst [vmem:[#allocation2] sm:$0xf] %v80_v9  ;;  %86 = vst [vmem:[#allocation3] sm:$0xf] %v85_v10 }
  0x12   :  { %v90_v11 = vld [vmem:[#allocation2] sm:$0xf]  ;;  %v100_v12 = vld [vmem:[#allocation3] sm:$0xf] }
  0x13   :  { %v92_v13 = vsel %vm91_vm1, %v90_v11, 0.0  ;;  %v101_v14 = vsel %vm91_vm1, %v100_v12, 0.0 }
  0x14   :  { %v93_v15 = vrot.slane %v92_v13, 4  ;;  %v102_v16 = vrot.slane %v101_v14, 4 }
  0x16   :  { %v94_v17 = vadd.f32 %v93_v15, %v92_v13  ;;  %v103_v18 = vadd.f32 %v102_v16, %v101_v14 }
  0x18   :  { %v95_v19 = vrot.slane %v94_v17, 2  ;;  %v104_v20 = vrot.slane %v103_v18, 2 }
  0x1a   :  { %v96_v21 = vadd.f32 %v95_v19, %v94_v17  ;;  %v105_v22 = vadd.f32 %v104_v20, %v103_v18 }
  0x1c   :  { %v97_v23 = vrot.slane %v96_v21, 1  ;;  %v106_v24 = vrot.slane %v105_v22, 1 }
  0x1e   :  { %v98_v25 = vadd.f32 %v97_v23, %v96_v21  ;;  %v107_v26 = vadd.f32 %v106_v24, %v105_v22 }
  0x20   :  { %99 = vst [vmem:[%s166_s2] sm:$0x1] %v98_v25  ;;  %108 = vst [vmem:[%s167_s3] sm:$0x1] %v107_v26 }

</bundles_post_ra>
